<compile_context>
chip_gen: v6e
topology: v6e:2x2x1
jax: 0.10.0
libtpu: 0.0.40
codegen_flags: <defaults>
</compile_context>

<pallas_src>
import jax
import jax.numpy as jnp
from jax.experimental import pallas as pl
from jax.experimental.pallas import tpu as pltpu


def gcn_kernel(a_ref, x_ref, w1_ref, b1_ref, w2_ref, b2_ref,
               wfc_ref, bfc_ref, out_ref):
    a = a_ref[...]                                            # [N, N] bf16

    # ---- GCNConv 1 (+ folded BN1) + ReLU:  relu((A @ X) @ W1' + b1') ----
    ax = jnp.dot(a, x_ref[...], preferred_element_type=jnp.float32)      # [N, IN]
    h = jnp.dot(ax.astype(jnp.bfloat16), w1_ref[...],
                preferred_element_type=jnp.float32)                      # [N, HID]
    h = jnp.maximum(h + b1_ref[...], 0.0)
    # ---- dropout: identity in eval mode ----

    # ---- GCNConv 2 (+ folded BN2) + ReLU:  relu(A @ (H @ W2') + b2') ----
    hw = jnp.dot(h.astype(jnp.bfloat16), w2_ref[...],
                 preferred_element_type=jnp.float32)                     # [N, HID]
    h2 = jnp.dot(a, hw.astype(jnp.bfloat16),
                 preferred_element_type=jnp.float32)
    h2 = jnp.maximum(h2 + b2_ref[...], 0.0)

    # ---- Linear: H2 @ Wfc + bfc ----
    out_ref[...] = (jnp.dot(h2.astype(jnp.bfloat16), wfc_ref[...],
                            preferred_element_type=jnp.float32)
                    + bfc_ref[...])


def gcn_forward(a_hat, x, params):
    """Fused GCN forward via pallas_call (single block, whole problem in VMEM)."""
    w1, b1, w2, b2, wfc, bfc = params
    N, in_c = x.shape
    hid_c = w1.shape[1]
    out_c = wfc.shape[1]

    # bf16 operands for the MXU; biases stay f32 (added to f32 accumulators).
    inputs = (a_hat.astype(jnp.bfloat16), x.astype(jnp.bfloat16),
              w1.astype(jnp.bfloat16), b1,
              w2.astype(jnp.bfloat16), b2,
              wfc.astype(jnp.bfloat16), bfc)

    vmem = pltpu.MemorySpace.VMEM
    in_specs = [pl.BlockSpec(memory_space=vmem) for _ in inputs]

    flops = 2 * (N * N * in_c          # A @ X
                 + N * in_c * hid_c    # (A@X) @ W1
                 + N * hid_c * hid_c   # H @ W2
                 + N * N * hid_c       # A @ (H@W2)
                 + N * hid_c * out_c)  # H2 @ Wfc
    bytes_accessed = sum(int(a.size) * a.dtype.itemsize for a in inputs) \
        + N * out_c * 4

    return pl.pallas_call(
        gcn_kernel,
        out_shape=jax.ShapeDtypeStruct((N, out_c), jnp.float32),
        in_specs=in_specs,
        out_specs=pl.BlockSpec(memory_space=vmem),
        cost_estimate=pl.CostEstimate(flops=flops, transcendentals=0,
                                      bytes_accessed=bytes_accessed),
    )(*inputs)


def build_normalized_adjacency(edge_index, num_nodes):
    """Dense A_hat = D^-1/2 (A + I) D^-1/2, matching GCNConv defaults
    (add_self_loops=True, normalize=True, unit edge weights).  Assumes
    edge_index carries no pre-existing self loops (scatter-add of unit
    weights, then self loops added explicitly)."""
    src, dst = edge_index[0], edge_index[1]
    a = jnp.zeros((num_nodes, num_nodes), jnp.float32).at[dst, src].add(1.0)
    a = a + jnp.eye(num_nodes, dtype=jnp.float32)          # self loops
    deg = a.sum(axis=1)
    dinv = jnp.where(deg > 0, jax.lax.rsqrt(deg), 0.0)
    return dinv[:, None] * a * dinv[None, :]


def init_params(key, in_c, hid_c, out_c):
    """Initialize GCN params and fold BN (running stats) + conv bias into the
    weights:  BN(XW + b) = X(W*s) + (b*s + t)."""
    ks = jax.random.split(key, 8)
    eps = 1e-5

    # GCNConv weights (PyTorch Linear stores [out, in]).
    w1 = jax.random.normal(ks[0], (hid_c, in_c), jnp.float32) * 0.1
    b1 = jax.random.normal(ks[1], (1, hid_c), jnp.float32) * 0.1
    w2 = jax.random.normal(ks[2], (hid_c, hid_c), jnp.float32) * 0.1
    b2 = jax.random.normal(ks[3], (1, hid_c), jnp.float32) * 0.1

    def bn_fold(km, kv):
        gamma = jnp.ones((1, hid_c), jnp.float32)
        beta = jnp.zeros((1, hid_c), jnp.float32)
        run_mean = jax.random.normal(km, (1, hid_c), jnp.float32) * 0.05
        run_var = jnp.abs(jax.random.normal(kv, (1, hid_c), jnp.float32)) * 0.5 + 0.5
        scale = gamma * jax.lax.rsqrt(run_var + eps)
        shift = beta - run_mean * scale
        return scale, shift

    s1, t1 = bn_fold(ks[4], ks[5])
    s2, t2 = bn_fold(ks[6], ks[7])

    kf1, kf2 = jax.random.split(jax.random.fold_in(key, 123))
    wfc = jax.random.normal(kf1, (out_c, hid_c), jnp.float32) * 0.1
    bfc = jax.random.normal(kf2, (1, out_c), jnp.float32) * 0.1

    # Fold BN into conv weights/biases (inference mode). Column (per-output-
    # channel) scaling commutes with the left-multiplication by A_hat.
    w1f = w1.T * s1                 # [in, hid]
    b1f = b1 * s1 + t1
    w2f = w2.T * s2                 # [hid, hid]
    b2f = b2 * s2 + t2
    return (w1f, b1f, w2f, b2f, wfc.T, bfc)


def reference_forward(a_hat, x, params):
    """Pure-JAX reference on the same bf16-rounded operands (f32 math)."""
    w1, b1, w2, b2, wfc, bfc = params
    a = a_hat.astype(jnp.bfloat16).astype(jnp.float32)
    xf = x.astype(jnp.bfloat16).astype(jnp.float32)
    w1f = w1.astype(jnp.bfloat16).astype(jnp.float32)
    w2f = w2.astype(jnp.bfloat16).astype(jnp.float32)
    wfcf = wfc.astype(jnp.bfloat16).astype(jnp.float32)
    h = jnp.maximum((a @ xf) @ w1f + b1, 0.0)
    h2 = jnp.maximum(a @ (h @ w2f) + b2, 0.0)
    return h2 @ wfcf + bfc


if __name__ == "__main__":
    N = 16            # number of graph nodes
    IN_C = 8          # in_channels
    HID_C = 32        # hidden_channels
    OUT_C = 4         # out_channels (number of clusters)

    key = jax.random.PRNGKey(0)
    kx, kp = jax.random.split(key)

    # Node features.
    x = jax.random.normal(kx, (N, IN_C), jnp.float32)

    # Undirected ring graph edge_index [2, 2N] (src, dst both directions).
    idx = jnp.arange(N)
    src = jnp.concatenate([idx, (idx + 1) % N])
    dst = jnp.concatenate([(idx + 1) % N, idx])
    edge_index = jnp.stack([src, dst], axis=0)

    a_hat = build_normalized_adjacency(edge_index, N)
    params = init_params(kp, IN_C, HID_C, OUT_C)

    out = jax.block_until_ready(gcn_forward(a_hat, x, params))
    ref = reference_forward(a_hat, x, params)

    assert out.shape == (N, OUT_C)
    # bf16 operands + bf16-rounded intermediates vs f32 reference math.
    assert jnp.allclose(out, ref, atol=1e-2, rtol=1e-2), "mismatch vs reference"

    print("KERNEL_OK")
</pallas_src>

<mosaic_0001>
module attributes {stable_mosaic.version = 11 : i64} {
  func.func @gcn_kernel(%arg0: memref<16x16xbf16, #tpu.memory_space<vmem>>, %arg1: memref<16x8xbf16, #tpu.memory_space<vmem>>, %arg2: memref<8x32xbf16, #tpu.memory_space<vmem>>, %arg3: memref<1x32xf32, #tpu.memory_space<vmem>>, %arg4: memref<32x32xbf16, #tpu.memory_space<vmem>>, %arg5: memref<1x32xf32, #tpu.memory_space<vmem>>, %arg6: memref<32x4xbf16, #tpu.memory_space<vmem>>, %arg7: memref<1x4xf32, #tpu.memory_space<vmem>>, %arg8: memref<16x4xf32, #tpu.memory_space<vmem>>) attributes {dimension_semantics = [], scalar_prefetch = 0 : i64, scratch_operands = 0 : i64, tpu.core_type = #tpu.core_type<tc>} {
    %c0 = arith.constant 0 : index
    %c0_0 = arith.constant 0 : index
    %0 = vector.load %arg0[%c0, %c0_0] : memref<16x16xbf16, #tpu.memory_space<vmem>>, vector<16x16xbf16>
    %c0_1 = arith.constant 0 : index
    %c0_2 = arith.constant 0 : index
    %1 = vector.load %arg1[%c0_1, %c0_2] : memref<16x8xbf16, #tpu.memory_space<vmem>>, vector<16x8xbf16>
    %cst = arith.constant dense<0.000000e+00> : vector<16x8xf32>
    %2 = tpu.matmul %0, %1, %cst {dimension_numbers = #tpu.dot_dimension_numbers<[1], [0], [0], [1], [0, 0, 1, 1], [], []>} : vector<16x16xbf16>, vector<16x8xbf16>, vector<16x8xf32> -> vector<16x8xf32>
    %3 = arith.truncf %2 : vector<16x8xf32> to vector<16x8xbf16>
    %c0_3 = arith.constant 0 : index
    %c0_4 = arith.constant 0 : index
    %4 = vector.load %arg2[%c0_3, %c0_4] : memref<8x32xbf16, #tpu.memory_space<vmem>>, vector<8x32xbf16>
    %cst_5 = arith.constant dense<0.000000e+00> : vector<16x32xf32>
    %5 = tpu.matmul %3, %4, %cst_5 {dimension_numbers = #tpu.dot_dimension_numbers<[1], [0], [0], [1], [0, 0, 1, 1], [], []>} : vector<16x8xbf16>, vector<8x32xbf16>, vector<16x32xf32> -> vector<16x32xf32>
    %c0_6 = arith.constant 0 : index
    %c0_7 = arith.constant 0 : index
    %6 = vector.load %arg3[%c0_6, %c0_7] : memref<1x32xf32, #tpu.memory_space<vmem>>, vector<1x32xf32>
    %7 = vector.broadcast %6 : vector<1x32xf32> to vector<16x32xf32>
    %8 = arith.addf %5, %7 : vector<16x32xf32>
    %cst_8 = arith.constant 0.000000e+00 : f32
    %9 = vector.broadcast %cst_8 : f32 to vector<16x32xf32>
    %10 = arith.maximumf %8, %9 : vector<16x32xf32>
    %11 = arith.truncf %10 : vector<16x32xf32> to vector<16x32xbf16>
    %c0_9 = arith.constant 0 : index
    %c0_10 = arith.constant 0 : index
    %12 = vector.load %arg4[%c0_9, %c0_10] : memref<32x32xbf16, #tpu.memory_space<vmem>>, vector<32x32xbf16>
    %cst_11 = arith.constant dense<0.000000e+00> : vector<16x32xf32>
    %13 = tpu.matmul %11, %12, %cst_11 {dimension_numbers = #tpu.dot_dimension_numbers<[1], [0], [0], [1], [0, 0, 1, 1], [], []>} : vector<16x32xbf16>, vector<32x32xbf16>, vector<16x32xf32> -> vector<16x32xf32>
    %14 = arith.truncf %13 : vector<16x32xf32> to vector<16x32xbf16>
    %cst_12 = arith.constant dense<0.000000e+00> : vector<16x32xf32>
    %15 = tpu.matmul %0, %14, %cst_12 {dimension_numbers = #tpu.dot_dimension_numbers<[1], [0], [0], [1], [0, 0, 1, 1], [], []>} : vector<16x16xbf16>, vector<16x32xbf16>, vector<16x32xf32> -> vector<16x32xf32>
    %c0_13 = arith.constant 0 : index
    %c0_14 = arith.constant 0 : index
    %16 = vector.load %arg5[%c0_13, %c0_14] : memref<1x32xf32, #tpu.memory_space<vmem>>, vector<1x32xf32>
    %17 = vector.broadcast %16 : vector<1x32xf32> to vector<16x32xf32>
    %18 = arith.addf %15, %17 : vector<16x32xf32>
    %cst_15 = arith.constant 0.000000e+00 : f32
    %19 = vector.broadcast %cst_15 : f32 to vector<16x32xf32>
    %20 = arith.maximumf %18, %19 : vector<16x32xf32>
    %21 = arith.truncf %20 : vector<16x32xf32> to vector<16x32xbf16>
    %c0_16 = arith.constant 0 : index
    %c0_17 = arith.constant 0 : index
    %22 = vector.load %arg6[%c0_16, %c0_17] : memref<32x4xbf16, #tpu.memory_space<vmem>>, vector<32x4xbf16>
    %cst_18 = arith.constant dense<0.000000e+00> : vector<16x4xf32>
    %23 = tpu.matmul %21, %22, %cst_18 {dimension_numbers = #tpu.dot_dimension_numbers<[1], [0], [0], [1], [0, 0, 1, 1], [], []>} : vector<16x32xbf16>, vector<32x4xbf16>, vector<16x4xf32> -> vector<16x4xf32>
    %c0_19 = arith.constant 0 : index
    %c0_20 = arith.constant 0 : index
    %24 = vector.load %arg7[%c0_19, %c0_20] : memref<1x4xf32, #tpu.memory_space<vmem>>, vector<1x4xf32>
    %25 = vector.broadcast %24 : vector<1x4xf32> to vector<16x4xf32>
    %26 = arith.addf %23, %25 : vector<16x4xf32>
    %c0_21 = arith.constant 0 : index
    %c0_22 = arith.constant 0 : index
    %27 = vector.load %arg8[%c0_21, %c0_22] : memref<16x4xf32, #tpu.memory_space<vmem>>, vector<16x4xf32>
    tpu.vector_store %arg8[%c0_21, %c0_22], %26 {strides = array<i32>} : memref<16x4xf32, #tpu.memory_space<vmem>>, vector<16x4xf32>,
    return
  }
}

</mosaic_0001>

<bundles_post_ra>
// kernel: tpu_custom_call.1
= control target key start
LH: loop header
LB: loop body
LE: loop exit
PB: predicated region body
PF: predicated region fallthrough
CT: control target
= control target key end

     0   :  { %v406_v0 = vmov 0.0   ;;  %vm407_vm0 = vmmov 0   ;;  %vm45_vm1 = vcmask 130048   ;;  %vm103_vm2 = vcmask 1043456   ;;  %s498_s1 = inlined_call_operand.vmem [shape: bf16[16,8], index: 1, kind: input, shape index: {}]   ;;  %s499_s0 = inlined_call_operand.vmem [shape: bf16[16,16], index: 0, kind: input, shape index: {}]   ;;  %s500_s2 = inlined_call_operand.vmem [shape: bf16[8,32], index: 2, kind: input, shape index: {}]   ;;  %s501_s4 = inlined_call_operand.vmem [shape: bf16[32,32], index: 4, kind: input, shape index: {}]   ;;  %s502_s3 = inlined_call_operand.vmem [shape: f32[1,32], index: 3, kind: input, shape index: {}]   ;;  %s503_s6 = inlined_call_operand.vmem [shape: bf16[32,4], index: 6, kind: input, shape index: {}]   ;;  %s504_s5 = inlined_call_operand.vmem [shape: f32[1,32], index: 5, kind: input, shape index: {}]   ;;  %s505_s7 = inlined_call_operand.vmem [shape: f32[1,4], index: 7, kind: input, shape index: {}]   ;;  %s506_s8 = inlined_call_operand.vmem [shape: f32[16,4], index: 8, kind: output, shape index: {}]  }
   0x1   :  { %364 = vmatprep.subr.bf16.mxu0 %v406_v0  ;;  %v400_v1 = vld [vmem:[%s498_s1] sm:$0xff]   ;;  %366 = vmatprep.mubr.msk.bf16.mxu0 %vm407_vm0, %v406_v0  ;;  %vm99_vm3 = vcmask 64512   ;;  %v402_v10 = vld [vmem:[%s501_s4 + $0x8] sm:$0xff]   ;;  %vm167_vm4 = vcmask 261120   ;;  %vm331_vm5 = vcmask 31744  }
   0x2   :  { %v401_v2 = vld [vmem:[%s499_s0] sm:$0xff]   ;;  %370 = vmatprep.subr.bf16.mxu1 %v406_v0  ;;  %372 = vmatprep.mubr.msk.bf16.mxu1 %vm407_vm0, %v406_v0  ;;  %v404_v27 = vld [vmem:[%s503_s6 + $0x8] sm:$0xff]  }
   0x3   :  { %365 = vmatpush3.bf16.msra.mxu0 %v400_v1  ;;  %v91_v3 = vld [vmem:[%s500_s2] sm:$0xf] }
   0x4   :  { %376 = vmatprep.subr.bf16.mxu0 %v406_v0  ;;  %v105_v4 = vsel %vm103_vm2, %v91_v3, 0  ;;  %v403_v11 = vld [vmem:[%s501_s4] sm:$0xff]  }
   0x5   :  { %371 = vmatpush3.bf16.msra.mxu1 %v105_v4  ;;  %v341_v12 = vld [vmem:[%s502_s3] ss:$0 sm:$0xff] }
   0x6   :  { %367 = vmatmul.mubr.msk.bf16.vlgmr.msra.gmra.mxu0 %vm45_vm1, %v401_v2  ;;  %384 = vmatprep.subr.bf16.mxu1 %v406_v0  ;;  %v405_v28 = vld [vmem:[%s503_s6] sm:$0xff]  }
   0x7   :  { %380 = vmatprep.mubr.msk.bf16.mxu0 %vm407_vm0, %v406_v0  ;;  %377 = vmatpush3.bf16.msra.mxu0 %v402_v10  ;;  %v346_v29 = vld [vmem:[%s504_s5] ss:$0 sm:$0xff] }
   0x8   :  { %378 = vmatprep.subr.bf16.mxu0 %v406_v0  ;;  %v348_v39 = vld [vmem:[%s505_s7] ss:$0 sm:$0xff] }
   0xb   :  { %379 = vmatpush3.bf16.msra.mxu0 %v403_v11 }
   0xc   :  { %390 = vmatprep.subr.bf16.mxu0 %v406_v0 }
  0xc6   :  { %v83_v5 = vpop.f32.mrf.mxu0 }
  0xc8   :  { %v368_v6 = vpop.f32.mrf.mxu0 }
  0xca   :  { %v86_v7 = vpop.f32.mrf.mxu0 }
  0xcb   :  { %v90_v8 = vpack.c.bf16 %v86_v7, %v83_v5 }
  0xcc   :  { %v369_v9 = vpop.f32.mrf.mxu0 }
  0xcd   :  { %373 = vmatmul.mubr.msk.bf16.vlgmr.msra.gmra.mxu1 %vm99_vm3, %v90_v8 }
  0xce   :  { %386 = vmatprep.mubr.msk.bf16.mxu1 %vm407_vm0, %v406_v0 }
 0x18d   :  { %v141_v13 = vpop.f32.mrf.mxu1 }
 0x18e   :  { %v142_v15 = vadd.f32 %v341_v12, %v141_v13 }
 0x18f   :  { %v374_v14 = vpop.f32.mrf.mxu1 }
 0x190   :  { %v148_v19 = vmax.f32 %v142_v15, 0.0 }
 0x191   :  { %v144_v16 = vpop.f32.mrf.mxu1 }
 0x192   :  { %v145_v17 = vadd.f32 %v341_v12, %v144_v16 }
 0x193   :  { %v375_v18 = vpop.f32.mrf.mxu1 }
 0x194   :  { %v149_v20 = vmax.f32 %v145_v17, 0.0 }
 0x196   :  { %v150_v21 = vpack.c.bf16 %v149_v20, %v148_v19 }
 0x198   :  { %381 = vmatmul.mubr.msk.bf16.vlgmr.msra.gmra.mxu0 %vm167_vm4, %v150_v21 }
 0x199   :  { %394 = vmatprep.mubr.msk.bf16.mxu0 %vm407_vm0, %v406_v0  ;;  %391 = vmatpush3.bf16.msra.mxu0 %v404_v27 }
 0x19a   :  { %392 = vmatprep.subr.bf16.mxu0 %v406_v0 }
 0x19d   :  { %393 = vmatpush3.bf16.msra.mxu0 %v405_v28 }
 0x258   :  { %v205_v22 = vpop.f32.mrf.mxu0 }
 0x25a   :  { %v382_v23 = vpop.f32.mrf.mxu0 }
 0x25c   :  { %v208_v24 = vpop.f32.mrf.mxu0 }
 0x25d   :  { %v212_v25 = vpack.c.bf16 %v208_v24, %v205_v22 }
 0x25e   :  { %v383_v26 = vpop.f32.mrf.mxu0 }
 0x25f   :  { %385 = vmatpush3.bf16.msra.mxu1 %v212_v25 }
 0x262   :  { %387 = vmatmul.mubr.msk.bf16.vlgmr.msra.gmra.mxu1 %vm45_vm1, %v401_v2 }
 0x322   :  { %v254_v30 = vpop.f32.mrf.mxu1 }
 0x323   :  { %v255_v32 = vadd.f32 %v346_v29, %v254_v30 }
 0x324   :  { %v388_v31 = vpop.f32.mrf.mxu1 }
 0x325   :  { %v261_v36 = vmax.f32 %v255_v32, 0.0 }
 0x326   :  { %v257_v33 = vpop.f32.mrf.mxu1 }
 0x327   :  { %v258_v34 = vadd.f32 %v346_v29, %v257_v33 }
 0x328   :  { %v389_v35 = vpop.f32.mrf.mxu1 }
 0x329   :  { %v262_v37 = vmax.f32 %v258_v34, 0.0 }
 0x32b   :  { %v263_v38 = vpack.c.bf16 %v262_v37, %v261_v36 }
 0x32d   :  { %395 = vmatmul.mubr.msk.bf16.vlgmr.msra.gmra.mxu0 %vm167_vm4, %v263_v38 }
 0x3ed   :  { %v324_v40 = vpop.f32.mrf.mxu0 }
 0x3ee   :  { %v325_v41 = vadd.f32 %v348_v39, %v324_v40 }
 0x3ef   :  { %v396_v42 = vpop.f32.mrf.mxu0 }
 0x3f0   :  { %332 = vst.msk [vmem:[%s506_s8] sm:$0xff] %vm331_vm5, %v325_v41 }
 0x3f1   :  { %v327_v43 = vpop.f32.mrf.mxu0 }
 0x3f2   :  { %v328_v44 = vadd.f32 %v348_v39, %v327_v43 }
 0x3f3   :  { %v397_v45 = vpop.f32.mrf.mxu0 }
 0x3f4   :  { %333 = vst.msk [vmem:[%s506_s8 + $0x8] sm:$0xff] %vm331_vm5, %v328_v44 }

</bundles_post_ra>
